<compile_context>
chip_gen: v5e
topology: v5e:2x2
jax: 0.10.0
libtpu: 0.0.40
codegen_flags: <defaults>
</compile_context>

<pallas_src>
import functools
import math

import jax
import jax.numpy as jnp
from jax import lax
from jax.experimental import pallas as pl
from jax.experimental.pallas import tpu as pltpu


_PAD_VAL = math.exp(-1.0)   # log(pad) == -1: folds the entropy term into the row-dot.


def _labeled_kernel(q_ref, p_ref, labels_ref, psum_aug_ref, out_ref, *, inv_d, use_bf16):
    """Per-row-tile loss partials, labeled path (dual formulation).

    q_ref, p_ref : [TM, D+1]  last column == exp(-1); its log is exactly -1, it adds
                              exactly 0 to `pos`, and it multiplies the entropy column
                              of W @ psum_aug in the row-dot (no transpose/broadcast).
    labels_ref   : [TM, N]    int8 (binary) or f32 (soft); w = 2 - labels on the VPU.
    psum_aug_ref : [N, D+1]   resident: [p + sum_v p_v | row entropy sum_d t*log t].
    out_ref      : [TM, 1]    positive/negative per row (summed in the wrapper).
    """
    q = q_ref[...]
    p = p_ref[...]
    logq = jnp.log(q)                                                   # unguarded, like the ref
    pos = jnp.sum(p * (jnp.log(p) - logq), axis=-1, keepdims=True) * inv_d

    # neg[i] = sum_j kl[i,j]*(2 - L[i,j])
    #        = inv_d * ((W@ent)[i] - sum_d logq[i,d]*(W@p_sum)[i,d])
    #        = -inv_d * sum_{d'} logq_aug[i,d'] * (W @ psum_aug)[i,d']
    w = 2.0 - labels_ref[...].astype(jnp.float32)                       # VPU, free filler
    psum_aug = psum_aug_ref[...]
    if use_bf16:
        w_mx = w.astype(jnp.bfloat16)          # {1,2} exact in bf16
        s_mx = psum_aug.astype(jnp.bfloat16)   # ~3x MXU throughput; f32 accumulate below
    else:
        w_mx, s_mx = w, psum_aug
    wp = lax.dot_general(w_mx, s_mx, (((1,), (0,)), ((), ())),
                         preferred_element_type=jnp.float32)            # [TM, D+1]
    neg = -inv_d * jnp.sum(logq * wp, axis=-1, keepdims=True)
    out_ref[...] = pos / neg


def _unlabeled_kernel(q_ref, p_ref, psum_tot_ref, out_ref, *, inv_d):
    """Unlabeled path: neg[i] only needs column-summed target statistics -> single
    row-dot per tile, no N x N matrix, no MXU matmul."""
    q = q_ref[...]
    p = p_ref[...]
    logq = jnp.log(q)
    pos = jnp.sum(p * (jnp.log(p) - logq), axis=-1, keepdims=True) * inv_d
    neg = -inv_d * jnp.sum(logq * psum_tot_ref[...], axis=-1, keepdims=True)
    out_ref[...] = pos / neg


def _pick_block_rows(n, requested=None):
    if requested is not None and n % requested == 0 and (requested % 8 == 0 or requested == n):
        return requested
    for cand in (512, 256, 128, 64, 32):     # multiples of 32: aligned for int8 label tiles
        if n % cand == 0:
            return cand
    return n                                  # full-block fallback (block == array dims)


def distribution_loss_with_label(q, p, qs=(), labels_matrix=None, temperature=1.0,
                                 *, block_rows=None, use_bf16_matmul=True):
    """JAX/Pallas equivalent of DistributionLossWithLabel.forward."""
    del temperature  # unused by the reference forward pass
    q = q.astype(jnp.float32)
    p = p.astype(jnp.float32)
    n, d = q.shape
    inv_d = 1.0 / d

    # ---- cheap O(V*N*D) cross-tile global statistics (plain XLA, per review) ----------
    p_sum = p
    ent = jnp.sum(p * jnp.log(p), axis=-1, keepdims=True)
    for q_v in qs:
        q_v = q_v.astype(jnp.float32)
        weight = (q_v * q_v) / jnp.sum(q_v, axis=0, keepdims=True)      # DEC target
        p_v = weight / jnp.sum(weight, axis=-1, keepdims=True)
        p_sum = p_sum + p_v
        ent = ent + jnp.sum(p_v * jnp.log(p_v), axis=-1, keepdims=True)
    psum_aug = jnp.concatenate([p_sum, ent], axis=-1)                    # [N, D+1]

    # Pad q/p with exp(-1): log() of that column is exactly -1 (entropy pickup in the
    # row-dot) and it contributes exactly 0 to `pos` (identical pad in q and p).
    pad = jnp.full((n, 1), _PAD_VAL, dtype=jnp.float32)
    q_aug = jnp.concatenate([q, pad], axis=-1)                           # [N, D+1]
    p_aug = jnp.concatenate([p, pad], axis=-1)                           # [N, D+1]

    tm = _pick_block_rows(n, block_rows)
    grid = (n // tm,)
    row_spec = pl.BlockSpec((tm, d + 1), lambda i: (i, 0))
    out_spec = pl.BlockSpec((tm, 1), lambda i: (i, 0))
    out_shape = jax.ShapeDtypeStruct((n, 1), jnp.float32)
    # Per-tile partial outputs => independent row axis => safe to mark "parallel"
    # (shards across both TensorCores on v7x).
    cparams = pltpu.CompilerParams(dimension_semantics=("parallel",))

    if labels_matrix is not None:
        labels_matrix = jnp.asarray(labels_matrix)
        if jnp.issubdtype(labels_matrix.dtype, jnp.floating):
            labels = labels_matrix.astype(jnp.float32)   # general (soft) labels
        else:
            labels = labels_matrix.astype(jnp.int8)      # binary labels: 4x less HBM traffic
        kernel = functools.partial(_labeled_kernel, inv_d=inv_d, use_bf16=use_bf16_matmul)
        ratio = pl.pallas_call(
            kernel,
            grid=grid,
            in_specs=[row_spec, row_spec,
                      pl.BlockSpec((tm, n), lambda i: (i, 0)),           # labels row tile
                      pl.BlockSpec((n, d + 1), lambda i: (0, 0))],       # resident psum_aug
            out_specs=out_spec,
            out_shape=out_shape,
            compiler_params=cparams,
        )(q_aug, p_aug, labels, psum_aug)
    else:
        psum_tot = jnp.sum(psum_aug, axis=0, keepdims=True)              # [1, D+1]
        kernel = functools.partial(_unlabeled_kernel, inv_d=inv_d)
        ratio = pl.pallas_call(
            kernel,
            grid=grid,
            in_specs=[row_spec, row_spec,
                      pl.BlockSpec((1, d + 1), lambda i: (0, 0))],
            out_specs=out_spec,
            out_shape=out_shape,
            compiler_params=cparams,
        )(q_aug, p_aug, psum_tot)

    return jnp.sum(ratio)


# ---------------------------- pure-JAX reference ---------------------------------------
def _target_distribution(q):
    weight = q ** 2 / jnp.sum(q, axis=0)
    return (weight.T / jnp.sum(weight, axis=1)).T


def _reference_loss(q, p, qs=(), labels_matrix=None):
    logq = jnp.log(q)
    pos = jnp.mean(p * (jnp.log(p) - logq), axis=1)

    def klmat(t):
        return jnp.mean(t[None, :, :] * (jnp.log(t)[None, :, :] - logq[:, None, :]), axis=-1)

    kl = klmat(p)
    for q_v in qs:
        kl = kl + klmat(_target_distribution(q_v))
    neg = jnp.sum(kl, axis=1)
    if labels_matrix is not None:
        neg = neg + jnp.sum(kl * (1.0 - labels_matrix), axis=1)
    return jnp.sum(pos / neg)


if __name__ == "__main__":
    key = jax.random.PRNGKey(0)
    n, d = 64, 32   # batch=64, distribution dim=32 (small, but enough rows to tile)
    k1, k2, k3, k4 = jax.random.split(key, 4)
    q = jax.nn.softmax(jax.random.normal(k1, (n, d)), axis=-1).astype(jnp.float32)
    p = jax.nn.softmax(jax.random.normal(k2, (n, d)), axis=-1).astype(jnp.float32)
    q_v = jax.nn.softmax(jax.random.normal(k3, (n, d)), axis=-1).astype(jnp.float32)
    labels_i8 = (jax.random.uniform(k4, (n, n)) > 0.5).astype(jnp.int8)
    labels_f32 = labels_i8.astype(jnp.float32)

    ref_full = _reference_loss(q, p, qs=(q_v,), labels_matrix=labels_f32)
    ref_plain = _reference_loss(q, p)

    # 1) full path: qs + int8 labels, bf16 MXU operands (default) -- relaxed tolerance.
    loss_bf16 = jax.block_until_ready(
        distribution_loss_with_label(q, p, qs=(q_v,), labels_matrix=labels_i8, block_rows=32))
    assert jnp.allclose(loss_bf16, ref_full, rtol=2e-2), (float(loss_bf16), float(ref_full))

    # 2) full path: f32 labels + f32 MXU -- tight check of the exact math / tiling.
    loss_f32 = jax.block_until_ready(
        distribution_loss_with_label(q, p, qs=(q_v,), labels_matrix=labels_f32,
                                     block_rows=32, use_bf16_matmul=False))
    assert jnp.allclose(loss_f32, ref_full, rtol=1e-4, atol=1e-6), (float(loss_f32), float(ref_full))

    # 3) unlabeled / no-qs path (specialized: no N^2 work at all).
    loss_plain = jax.block_until_ready(
        distribution_loss_with_label(q, p, block_rows=32))
    assert jnp.allclose(loss_plain, ref_plain, rtol=1e-4, atol=1e-6), (float(loss_plain), float(ref_plain))

    print("KERNEL_OK")
</pallas_src>

<mosaic_0001>
module attributes {stable_mosaic.version = 11 : i64} {
  func.func @_labeled_kernel(%arg0: i32, %arg1: memref<32x33xf32, #tpu.memory_space<vmem>>, %arg2: memref<32x33xf32, #tpu.memory_space<vmem>>, %arg3: memref<32x64xi8, #tpu.memory_space<vmem>>, %arg4: memref<64x33xf32, #tpu.memory_space<vmem>>, %arg5: memref<32x1xf32, #tpu.memory_space<vmem>>) attributes {dimension_semantics = [#tpu.dimension_semantics<parallel>], iteration_bounds = array<i64: 2>, scalar_prefetch = 0 : i64, scratch_operands = 0 : i64, tpu.core_type = #tpu.core_type<tc>, window_params = [{transform_indices = @transform_0, window_bounds = array<i64: 32, 33>}, {transform_indices = @transform_1, window_bounds = array<i64: 32, 33>}, {transform_indices = @transform_2, window_bounds = array<i64: 32, 64>}, {pipeline_mode = #tpu.pipeline_mode<synchronous>, transform_indices = @transform_3, window_bounds = array<i64: 64, 33>}, {transform_indices = @transform_4, window_bounds = array<i64: 32, 1>}]} {
    %c0 = arith.constant 0 : index
    %c0_0 = arith.constant 0 : index
    %0 = vector.load %arg1[%c0, %c0_0] : memref<32x33xf32, #tpu.memory_space<vmem>>, vector<32x33xf32>
    %c0_1 = arith.constant 0 : index
    %c0_2 = arith.constant 0 : index
    %1 = vector.load %arg2[%c0_1, %c0_2] : memref<32x33xf32, #tpu.memory_space<vmem>>, vector<32x33xf32>
    %2 = math.log %0 : vector<32x33xf32>
    %3 = math.log %1 : vector<32x33xf32>
    %4 = arith.subf %3, %2 : vector<32x33xf32>
    %5 = arith.mulf %1, %4 : vector<32x33xf32>
    %cst = arith.constant dense<0.000000e+00> : vector<32xf32>
    %6 = vector.multi_reduction <add>, %5, %cst [1] : vector<32x33xf32> to vector<32xf32>
    %7 = vector.shape_cast %6 : vector<32xf32> to vector<32x1xf32>
    %cst_3 = arith.constant 3.125000e-02 : f32
    %8 = vector.broadcast %cst_3 : f32 to vector<32x1xf32>
    %9 = arith.mulf %7, %8 : vector<32x1xf32>
    %c0_4 = arith.constant 0 : index
    %c0_5 = arith.constant 0 : index
    %10 = vector.load %arg3[%c0_4, %c0_5] : memref<32x64xi8, #tpu.memory_space<vmem>>, vector<32x64xi8>
    %11 = arith.sitofp %10 : vector<32x64xi8> to vector<32x64xf32>
    %cst_6 = arith.constant 2.000000e+00 : f32
    %12 = vector.broadcast %cst_6 : f32 to vector<32x64xf32>
    %13 = arith.subf %12, %11 : vector<32x64xf32>
    %c0_7 = arith.constant 0 : index
    %c0_8 = arith.constant 0 : index
    %14 = vector.load %arg4[%c0_7, %c0_8] : memref<64x33xf32, #tpu.memory_space<vmem>>, vector<64x33xf32>
    %15 = arith.truncf %13 : vector<32x64xf32> to vector<32x64xbf16>
    %16 = arith.truncf %14 : vector<64x33xf32> to vector<64x33xbf16>
    %cst_9 = arith.constant dense<0.000000e+00> : vector<32x33xf32>
    %17 = tpu.matmul %15, %16, %cst_9 {dimension_numbers = #tpu.dot_dimension_numbers<[1], [0], [0], [1], [0, 0, 1, 1], [], []>} : vector<32x64xbf16>, vector<64x33xbf16>, vector<32x33xf32> -> vector<32x33xf32>
    %18 = arith.mulf %2, %17 : vector<32x33xf32>
    %cst_10 = arith.constant dense<0.000000e+00> : vector<32xf32>
    %19 = vector.multi_reduction <add>, %18, %cst_10 [1] : vector<32x33xf32> to vector<32xf32>
    %20 = vector.shape_cast %19 : vector<32xf32> to vector<32x1xf32>
    %cst_11 = arith.constant -3.125000e-02 : f32
    %21 = vector.broadcast %cst_11 : f32 to vector<32x1xf32>
    %22 = arith.mulf %21, %20 : vector<32x1xf32>
    %23 = arith.divf %9, %22 : vector<32x1xf32>
    %c0_12 = arith.constant 0 : index
    %c0_13 = arith.constant 0 : index
    %24 = vector.load %arg5[%c0_12, %c0_13] : memref<32x1xf32, #tpu.memory_space<vmem>>, vector<32x1xf32>
    tpu.vector_store %arg5[%c0_12, %c0_13], %23 {strides = array<i32>} : memref<32x1xf32, #tpu.memory_space<vmem>>, vector<32x1xf32>,
    return
  }
  func.func @transform_0(%arg0: i32) -> (i32, i32) {
    %c0_i32 = arith.constant 0 : i32
    %c0_i32_0 = arith.constant 0 : i32
    return %arg0, %c0_i32 : i32, i32
  }
  func.func @transform_1(%arg0: i32) -> (i32, i32) {
    %c0_i32 = arith.constant 0 : i32
    %c0_i32_0 = arith.constant 0 : i32
    return %arg0, %c0_i32 : i32, i32
  }
  func.func @transform_2(%arg0: i32) -> (i32, i32) {
    %c0_i32 = arith.constant 0 : i32
    %c0_i32_0 = arith.constant 0 : i32
    return %arg0, %c0_i32 : i32, i32
  }
  func.func @transform_3(%arg0: i32) -> (i32, i32) {
    %c0_i32 = arith.constant 0 : i32
    %c0_i32_0 = arith.constant 0 : i32
    %c0_i32_1 = arith.constant 0 : i32
    return %c0_i32, %c0_i32_0 : i32, i32
  }
  func.func @transform_4(%arg0: i32) -> (i32, i32) {
    %c0_i32 = arith.constant 0 : i32
    %c0_i32_0 = arith.constant 0 : i32
    return %arg0, %c0_i32 : i32, i32
  }
}

</mosaic_0001>

<bundles_post_ra>
// kernel: tpu_custom_call.1
= control target key start
LH: loop header
LB: loop body
LE: loop exit
PB: predicated region body
PF: predicated region fallthrough
CT: control target
= control target key end

     0   :  { %s593_s15 = smov 0   ;;  %s698_s0 = inlined_call_operand.vmem [shape: f32[64,33], index: 0, kind: input, shape index: {}]   ;;  %s699_s1 = inlined_call_operand.vmem [shape: f32[64,33], index: 1, kind: input, shape index: {}]   ;;  %s700_s2 = inlined_call_operand.vmem [shape: s8[64,64], index: 2, kind: input, shape index: {}]   ;;  %s701_s3 = inlined_call_operand.vmem [shape: f32[64,33], index: 3, kind: input, shape index: {}]   ;;  %s702_s4 = inlined_call_operand.vmem [shape: f32[64,1], index: 4, kind: output, shape index: {}]  }
   0x1 LB: > { %s599_s16 = sadd.s32 4294967295, %s566_s15   ;;  %p512_p0 = scmp.ge.s32.totalorder %s566_s15, 1  ;;  %s566_s15 = sphi %s593_s15, %s14_s15  }
   0x2   : > { %p183_p1 = scmp.lt.s32.totalorder %s566_s15, 3 }
   0x4   : > { %p184_p2 = pnand %p512_p0, %p183_p1 }
   0x5   : > { %p230_p3 = scmp.lt.s32.totalorder (!%p184_p2), %s599_s16, 1  ;;  %s513_s12 = sshll.u32 (!%p184_p2), %s599_s16, 2 }
   0x6   : > { %187 = sbr.rel (%p184_p2) target bundleno = 305 (0x131), region = 36  ;;  %p219_p4 = scmp.lt.s32.totalorder (!%p184_p2), %s513_s12, 7 }
   0xb   : > { %v309_v0 = vld [vmem:[%s701_s3 + $0x30] sm:$0xff]  ;;  %v310_v1 = vld [vmem:[%s701_s3 + $0x38] sm:$0xff]  ;;  %v307_v2 = vld [vmem:[%s701_s3 + $0x20] sm:$0xff]  ;;  %s231_s25 = scalar_select %p230_p3, %s599_s16, 1  ;;  %vm317_vm0 = vcmask 523264   ;;  %vm273_vm1 = vcmask 269312  }
   0xc   : > { %v316_v3 = vpack.c.bf16 %v310_v1, %v309_v0  ;;  %v308_v4 = vld [vmem:[%s701_s3 + $0x28] sm:$0xff]  ;;  %v305_v6 = vld [vmem:[%s701_s3 + $0x10] sm:$0xff]  ;;  %v306_v7 = vld [vmem:[%s701_s3 + $0x18] sm:$0xff]  ;;  %s706_s12 = smov (!%p219_p4, %s513_s12), 7  ;;  %vm423_vm6 = vcmask 7168  }
   0xd   : > { %v315_v5 = vpack.c.bf16 %v308_v4, %v307_v2  ;;  %s517_s30 = sshll.u32 %s231_s25, 3  ;;  %v314_v8 = vpack.c.bf16 %v306_v7, %v305_v6  ;;  %v303_v10 = vld [vmem:[%s701_s3] sm:$0xff]  ;;  %v304_v11 = vld [vmem:[%s701_s3 + $0x8] sm:$0xff]  ;;  %s633_s13 = sshll.u32 %s706_s12, 3 }
   0xe   : > { %328 = vmatpush.bf16.msra.mxu0 %v316_v3  ;;  %524 = vmatpush.bf16.msra.mxu1 %v316_v3  ;;  %s233_s7 = scalar_lea.vmem %s700_s2, %s517_s30  ;;  %v313_v20 = vpack.c.bf16 %v304_v11, %v303_v10  ;;  %s222_s18 = scalar_lea.vmem %s698_s0, %s633_s13 }
   0xf   : > { %v290_v9 = vld [vmem:[%s233_s7] sm:$0xff]  ;;  %s228_s21 = scalar_lea.vmem %s699_s1, %s633_s13  ;;  %v242_v29 = vld [vmem:[%s222_s18 + $0x8] sm:$0xff]  ;;  %v243_v35 = vld [vmem:[%s222_s18 + $0x10] sm:$0xff]  ;;  %s669_s23 = scalar_lea.vmem %s702_s4, %s633_s13 }
  0x10   : > { %v291_v12 = vunpack.c.0.s8 %v290_v9  ;;  %v292_v13 = vunpack.c.1.s8 %v290_v9  ;;  %v293_v14 = vunpack.c.2.s8 %v290_v9  ;;  %v294_v15 = vunpack.c.3.s8 %v290_v9  ;;  %v241_v27 = vld [vmem:[%s222_s18] sm:$0xff]  ;;  %v246_v32 = vld [vmem:[%s228_s21 + $0x8] sm:$0xff]  ;;  %v244_v42 = vld [vmem:[%s222_s18 + $0x18] sm:$0xff] }
  0x11   : > { %536 = vlog2.f32 %v241_v27  ;;  %v245_v28 = vld [vmem:[%s228_s21] sm:$0xff]  ;;  %v247_v44 = vld [vmem:[%s228_s21 + $0x10] sm:$0xff]  ;;  %v248_v45 = vld [vmem:[%s228_s21 + $0x18] sm:$0xff] }
  0x12   : > { %329 = vmatpush.bf16.msra.mxu0 %v315_v5  ;;  %525 = vmatpush.bf16.msra.mxu1 %v315_v5  ;;  %v295_v16 = vcvt.s32.f32 %v291_v12  ;;  %v296_v17 = vcvt.s32.f32 %v292_v13  ;;  %v297_v18 = vcvt.s32.f32 %v293_v14  ;;  %v298_v19 = vcvt.s32.f32 %v294_v15 }
  0x13   : > { %538 = vlog2.f32 %v245_v28 }
  0x14   : > { %v299_v21 = vsub.f32 2.0, %v295_v16  ;;  %v300_v22 = vsub.f32 2.0, %v296_v17  ;;  %v301_v23 = vsub.f32 2.0, %v297_v18  ;;  %v302_v24 = vsub.f32 2.0, %v298_v19 }
  0x15   : > { %540 = vlog2.f32 %v242_v29 }
  0x16   : > { %330 = vmatpush.bf16.msra.mxu0 %v314_v8  ;;  %526 = vmatpush.bf16.msra.mxu1 %v314_v8  ;;  %v311_v25 = vpack.c.bf16 %v300_v22, %v299_v21  ;;  %v312_v26 = vpack.c.bf16 %v302_v24, %v301_v23  ;;  %542 = vlog2.f32 %v246_v32 }
  0x17   : > { %v537_v30 = vpop.eup %536  ;;  %544 = vlog2.f32 %v243_v35 }
  0x18   : > { %v250_v33 = vmul.f32 0.6931472, %v537_v30  ;;  %546 = vlog2.f32 %v244_v42 }
  0x19   : > { %v539_v31 = vpop.eup %538  ;;  %548 = vlog2.f32 %v247_v44 }
  0x1a   : > { %331 = vmatpush.bf16.msra.mxu0 %v313_v20  ;;  %527 = vmatpush.bf16.msra.mxu1 %v313_v20  ;;  %v258_v34 = vmul.f32 0.6931472, %v539_v31  ;;  %550 = vlog2.f32 %v248_v45 }
  0x1b   : > { %v541_v38 = vpop.eup %540 }
  0x1c   : > { %v265_v36 = vsub.f32 %v258_v34, %v250_v33  ;;  %v543_v40 = vpop.eup %542  ;;  %v252_v41 = vmul.f32 0.6931472, %v541_v38 }
  0x1d   : > { %520 = vmatmul.msk.bf16.vlgmr.msra.gmra.mxu0 %vm317_vm0, %v311_v25  ;;  %521 = vmatmul.msk.bf16.vlgmr.msra.gmra.mxu1 %vm317_vm0, %v312_v26  ;;  %v260_v43 = vmul.f32 0.6931472, %v543_v40  ;;  %v545_v47 = vpop.eup %544 }
  0x1e   : > { %v269_v37 = vmul.f32 %v265_v36, %v245_v28  ;;  %v254_v49 = vmul.f32 0.6931472, %v545_v47  ;;  %v547_v51 = vpop.eup %546 }
  0x1f   : > { %v266_v46 = vsub.f32 %v260_v43, %v252_v41  ;;  %v549_v54 = vpop.eup %548  ;;  %v256_v60 = vmul.f32 0.6931472, %v547_v51 }
  0x20   : > { %v274_v39 = vsel %vm273_vm1, %v269_v37, 0.0  ;;  %v551_v57 = vpop.eup %550  ;;  %v262_v61 = vmul.f32 0.6931472, %v549_v54 }
  0x21   : > { %275 = vadd.xlane.f32.xlu2 %v274_v39  ;;  %v270_v48 = vmul.f32 %v266_v46, %v246_v32  ;;  %v264_v62 = vmul.f32 0.6931472, %v551_v57 }
  0x22   : > { %v267_v3 = vsub.f32 %v262_v61, %v254_v49 }
  0x23   : > { %v277_v50 = vsel %vm273_vm1, %v270_v48, 0.0  ;;  %v268_v4 = vsub.f32 %v264_v62, %v256_v60 }
  0x24   : > { %v271_v7 = vmul.f32 %v267_v3, %v247_v44 }
  0x25   : > { %v272_v8 = vmul.f32 %v268_v4, %v248_v45 }
  0x26   : > { %v280_v9 = vsel %vm273_vm1, %v271_v7, 0.0 }
  0x27   : > { %v283_v10 = vsel %vm273_vm1, %v272_v8, 0.0 }
  0x29   : > { %278 = vadd.xlane.f32.xlu2 %v277_v50 }
  0x94   : > { %v276_v22 = vpop.xlane.xlu2 %275 }
  0x95   : > { %v286_v32 = vmul.f32 0.03125, %v276_v22 }
  0x9a   : > { %v333_v52 = vpop.f32.mrf.mxu0  ;;  %v338_v53 = vpop.f32.mrf.mxu1 }
  0x9b   : > { %v343_v55 = vmul.f32 %v333_v52, %v250_v33  ;;  %v345_v56 = vmul.f32 %v338_v53, %v254_v49 }
  0x9c   : > { %v279_v42 = vpop.xlane.xlu2 %278 }
  0x9d   : > { %v353_v58 = vsel %vm273_vm1, %v345_v56, 0.0  ;;  %v347_v59 = vsel %vm273_vm1, %v343_v55, 0.0  ;;  %v287_v54 = vmul.f32 0.03125, %v279_v42 }
  0x9e   : > { %354 = vadd.xlane.f32.xlu1 %v353_v58  ;;  %348 = vadd.xlane.f32.xlu0 %v347_v59 }
  0xa2   : > { %v335_v63 = vpop.f32.mrf.mxu0  ;;  %v340_v0 = vpop.f32.mrf.mxu1 }
  0xa3   : > { %v344_v1 = vmul.f32 %v335_v63, %v252_v41  ;;  %v346_v2 = vmul.f32 %v340_v0, %v256_v60 }
  0xa5   : > { %v356_v5 = vsel %vm273_vm1, %v346_v2, 0.0  ;;  %v350_v6 = vsel %vm273_vm1, %v344_v1, 0.0 }
  0xa6   : > { %357 = vadd.xlane.f32.xlu1 %v356_v5  ;;  %351 = vadd.xlane.f32.xlu0 %v350_v6 }
  0xae   : > { %281 = vadd.xlane.f32.xlu0 %v280_v9  ;;  %284 = vadd.xlane.f32.xlu1 %v283_v10 }
 0x111   : > { %v355_v11 = vpop.xlane.xlu1 %354  ;;  %v349_v12 = vpop.xlane.xlu0 %348 }
 0x112   : > { %v361_v13 = vmul.f32 -0.03125, %v355_v11  ;;  %v359_v14 = vmul.f32 -0.03125, %v349_v12 }
 0x114   : > { %552 = vrcp.f32 %v361_v13  ;;  %v374_v26 = vand.u32 2147483648, %v359_v14  ;;  %v372_v28 = vand.u32 2147483647, %v359_v14  ;;  %vm368_vm3 = vweird.f32 %v359_v14 }
 0x115   : > { %554 = vrcp.f32 %v359_v14  ;;  %vm398_vm4 = vweird.f32 %v361_v13  ;;  %v402_v37 = vand.u32 2147483647, %v361_v13  ;;  %v404_v43 = vand.u32 2147483648, %v361_v13 }
 0x116   : > { %v375_v35 = vor.u32 1.1754944e-38, %v374_v26  ;;  %vm373_vm7 = vcmp.eq.f32.partialorder %v372_v28, 8.507059e+37 }
 0x117   : > { %vm403_vm12 = vcmp.eq.f32.partialorder %v402_v37, 8.507059e+37  ;;  %v405_v58 = vor.u32 1.1754944e-38, %v404_v43 }
 0x119   : > { %v358_v15 = vpop.xlane.xlu1 %357  ;;  %v352_v16 = vpop.xlane.xlu0 %351 }
 0x11a   : > { %v651_v17 = vpop.eup %552  ;;  %v653_v18 = vmul.f32 -0.03125, %v358_v15  ;;  %v655_v19 = vmul.f32 -0.03125, %v352_v16 }
 0x11b   : > { %v555_v20 = vpop.eup %554  ;;  %v394_v21 = vmul.f32 %v651_v17, %v361_v13  ;;  %vm399_vm8 = vweird.f32 %v651_v17 }
 0x11c   : > { %v364_v23 = vmul.f32 %v555_v20, %v359_v14  ;;  %556 = vrcp.f32 %v653_v18  ;;  %vm369_vm2 = vweird.f32 %v555_v20  ;;  %v417_v45 = vand.u32 2147483647, %v653_v18  ;;  %vm675_vm10 = vmor %vm398_vm4, %vm399_vm8 }
 0x11d   : > { %558 = vrcp.f32 %v655_v19  ;;  %v395_v24 = vsub.f32 1.0, %v394_v21  ;;  %vm370_vm5 = vmor %vm368_vm3, %vm369_vm2  ;;  %v419_v48 = vand.u32 2147483648, %v653_v18  ;;  %v389_v49 = vand.u32 2147483648, %v655_v19 }
 0x11e   : > { %v365_v25 = vsub.f32 1.0, %v364_v23  ;;  %v387_v53 = vand.u32 2147483647, %v655_v19  ;;  %vm413_vm13 = vweird.f32 %v653_v18  ;;  %vm418_vm15 = vcmp.eq.f32.partialorder %v417_v45, 8.507059e+37 }
 0x11f   : > { %v396_v29 = vmul.f32 %v651_v17, %v395_v24  ;;  %vm383_vm0 = vweird.f32 %v655_v19  ;;  %v420_v62 = vor.u32 1.1754944e-38, %v419_v48  ;;  %v390_v63 = vor.u32 1.1754944e-38, %v389_v49 }
 0x120   : > { %v366_v27 = vmul.f32 %v555_v20, %v365_v25  ;;  %vm388_vm2 = vcmp.eq.f32.partialorder %v387_v53, 8.507059e+37 }
 0x121   : > { %v397_v39 = vadd.f32 %v651_v17, %v396_v29  ;;  %v282_v51 = vpop.xlane.xlu0 %281  ;;  %v285_v57 = vpop.xlane.xlu1 %284 }
 0x122   : > { %v557_v30 = vpop.eup %556  ;;  %v367_v31 = vadd.f32 %v555_v20, %v366_v27  ;;  %v288_v60 = vmul.f32 0.03125, %v282_v51  ;;  %v289_v1 = vmul.f32 0.03125, %v285_v57 }
 0x123   : > { %v559_v33 = vpop.eup %558  ;;  %v409_v34 = vmul.f32 %v557_v30, %v653_v18  ;;  %vm414_vm9 = vweird.f32 %v557_v30  ;;  %v401_v55 = vsel %vm675_vm10, %v651_v17, %v397_v39 }
 0x124   : > { %v379_v36 = vmul.f32 %v559_v33, %v655_v19  ;;  %v371_v38 = vsel %vm370_vm5, %v555_v20, %v367_v31  ;;  %vm384_vm11 = vweird.f32 %v559_v33  ;;  %vm415_vm14 = vmor %vm413_vm13, %vm414_vm9  ;;  %v406_v0 = vsel %vm403_vm12, %v405_v58, %v401_v55 }
 0x125   : > { %v376_v40 = vsel %vm373_vm7, %v375_v35, %v371_v38  ;;  %v410_v41 = vsub.f32 1.0, %v409_v34  ;;  %vm385_vm1 = vmor %vm383_vm0, %vm384_vm11  ;;  %v407_v6 = vmul.f32 %v406_v0, %v288_v60 }
 0x126   : > { %v377_v44 = vmul.f32 %v376_v40, %v286_v32  ;;  %v380_v46 = vsub.f32 1.0, %v379_v36 }
 0x127   : > { %v411_v47 = vmul.f32 %v557_v30, %v410_v41  ;;  %426 = vst.msk [vmem:[%s669_s23 + $0x10] sm:$0xff] %vm423_vm6, %v407_v6 }
 0x128   : > { %424 = vst.msk [vmem:[%s669_s23] sm:$0xff] %vm423_vm6, %v377_v44  ;;  %v381_v52 = vmul.f32 %v559_v33, %v380_v46 }
 0x129   : > { %v412_v56 = vadd.f32 %v557_v30, %v411_v47 }
 0x12a   : > { %v382_v59 = vadd.f32 %v559_v33, %v381_v52 }
 0x12b   : > { %v416_v61 = vsel %vm415_vm14, %v557_v30, %v412_v56 }
 0x12c   : > { %v386_v2 = vsel %vm385_vm1, %v559_v33, %v382_v59  ;;  %v421_v3 = vsel %vm418_vm15, %v420_v62, %v416_v61 }
 0x12d   : > { %v391_v4 = vsel %vm388_vm2, %v390_v63, %v386_v2  ;;  %v422_v7 = vmul.f32 %v421_v3, %v289_v1 }
 0x12e   : > { %v392_v5 = vmul.f32 %v391_v4, %v287_v54 }
 0x12f   : > { %427 = vst.msk [vmem:[%s669_s23 + $0x18] sm:$0xff] %vm423_vm6, %v422_v7 }
 0x130   : > { %425 = vst.msk [vmem:[%s669_s23 + $0x8] sm:$0xff] %vm423_vm6, %v392_v5 }
 0x131 PF: > { %s14_s15 = sadd.s32 1, %s566_s15  }
 0x132   : > { %p11_p5 = scmp.ge.s32.totalorder %s14_s15, 4  }
 0x134   :  { %13 = sbr.rel (!%p11_p5) target bundleno = 1 (0x1), region = 72 }

</bundles_post_ra>
